<compile_context>
chip_gen: v5e
topology: v5e:2x2
jax: 0.10.0
libtpu: 0.0.40
codegen_flags: <defaults>
</compile_context>

<pallas_src>
import functools

import jax
import jax.numpy as jnp
from jax.experimental import pallas as pl
from jax.experimental.pallas import tpu as pltpu


_VMEM_LIMIT_BYTES = 48 * 1024 * 1024  # safe on v5e/v6e (128 MiB) and v7x (64 MiB)


def _block_bytes_per_operand():
    """Per-operand block budget, tuned per TPU generation (static, trace-time)."""
    try:
        kind = jax.devices()[0].device_kind.lower()
    except Exception:  # pragma: no cover - e.g. AOT / interpret environments
        kind = ""
    if "v7" in kind:
        # 3.2 TB/s HBM: bigger blocks to amortize the ~0.35 us per-step overhead.
        # 3 operands x 2 buffers x 6 MiB = 36 MiB live, under the 48 MiB limit.
        return 6 * 1024 * 1024
    # v5e / v6e (and unknown): 4 MiB -> 24 MiB live.
    return 4 * 1024 * 1024


def _sublane_multiple(itemsize):
    """Row granularity so packed dtypes stay fully packed (8 f32, 16 bf16, 32 i8)."""
    return {4: 8, 2: 16, 1: 32}.get(int(itemsize), 8)


def _row_tile(n_rows, bytes_per_row, sublane, block_bytes):
    """Row tile: ~block_bytes per operand, sublane-aligned, >=2 grid steps if possible."""
    target = max(sublane, (block_bytes // max(1, bytes_per_row) // sublane) * sublane)
    if n_rows <= target:
        # Whole tensor fits in one block: still split in two when we can so the
        # ("parallel",) grid shards across both TensorCores on v7x.
        if n_rows >= 2 * sublane:
            half = -(-n_rows // 2)                       # ceil(n_rows / 2)
            return (-(-half // sublane)) * sublane       # round up to sublane
        return n_rows                                    # tiny: full-extent block
    return target


def _lane_dense_layout(total):
    """(rows, cols, padded_total) with cols a large multiple of 128 (unmasked vst)."""
    for w in (2048, 1024, 512, 256, 128):
        if total % w == 0:
            return total // w, w, total
    # Ragged flat size: pad to a multiple of 512 so the lane axis stays dense.
    # (The pad is one extra copy in the wrapper; masked partial stores in the
    #  kernel are the documented bigger loss for mem-bound kernels.)
    w = 512
    padded = (-(-total // w)) * w
    return padded // w, w, padded


def _make_add_kernel(const):
    """out = x + residual * const   (const folded in at trace time)."""
    c = float(const)

    def kernel(x_ref, r_ref, o_ref):
        r = r_ref[...]
        if c != 1.0:
            r = r * c
        o_ref[...] = x_ref[...] + r

    return kernel


def _scaled_add_kernel(x_ref, r_ref, s_ref, o_ref):
    """out = x + residual * scale; scale is (1, tc) f32 with the constant pre-folded."""
    r = r_ref[...] * s_ref[...]               # promotes to f32 (PyTorch-like precision)
    o_ref[...] = (x_ref[...] + r).astype(o_ref.dtype)


@functools.partial(jax.jit, static_argnames=("scale_residual_constant",))
def residual_forward(x, residual, residual_scale=None, scale_residual_constant=1.0):
    """Pallas implementation of Residual.forward.

    x, residual            : same shape, feature dim last.
    residual_scale         : optional (dim,) parameter (scale_residual=True).
    scale_residual_constant: python float (static).
    """
    assert x.shape == residual.shape
    orig_shape = x.shape
    dtype = x.dtype
    c = float(scale_residual_constant)
    itemsize = jnp.dtype(dtype).itemsize
    sublane = _sublane_multiple(itemsize)
    block_bytes = _block_bytes_per_operand()

    if residual_scale is None:
        # ---- No per-feature scale: flatten and re-view lane-dense. ----
        total = x.size
        rows, cols, padded = _lane_dense_layout(total)
        x_flat = x.reshape(-1)
        r_flat = residual.reshape(-1)
        if padded != total:
            x_flat = jnp.pad(x_flat, (0, padded - total))
            r_flat = jnp.pad(r_flat, (0, padded - total))
        x2 = x_flat.reshape(rows, cols)
        r2 = r_flat.reshape(rows, cols)
        tr = _row_tile(rows, cols * itemsize, sublane, block_bytes)
        out = pl.pallas_call(
            _make_add_kernel(c),
            out_shape=jax.ShapeDtypeStruct((rows, cols), dtype),
            grid=(pl.cdiv(rows, tr),),
            in_specs=[
                pl.BlockSpec((tr, cols), lambda i: (i, 0)),
                pl.BlockSpec((tr, cols), lambda i: (i, 0)),
            ],
            out_specs=pl.BlockSpec((tr, cols), lambda i: (i, 0)),
            compiler_params=pltpu.CompilerParams(
                dimension_semantics=("parallel",),
                vmem_limit_bytes=_VMEM_LIMIT_BYTES,
            ),
        )(x2, r2)
        if padded != total:
            out = out.reshape(-1)[:total]
        return out.reshape(orig_shape)

    # ---- Per-feature scale: feature dim last (lane axis), 2-D (row, col) grid. ----
    d = orig_shape[-1]
    rows = x.size // d
    x2 = x.reshape(rows, d)
    r2 = residual.reshape(rows, d)
    # Fold the python constant into the tiny (1, d) scale (free); keep it in f32 so
    # the in-kernel multiply happens in f32 even for bf16 activations.
    s2 = (residual_scale.astype(jnp.float32) * c).reshape(1, d)

    d_pad = d
    if d % 128 != 0:
        # Pad the lane axis to a multiple of 128 so stores are unmasked vst.
        d_pad = (-(-d // 128)) * 128
        x2 = jnp.pad(x2, ((0, 0), (0, d_pad - d)))
        r2 = jnp.pad(r2, ((0, 0), (0, d_pad - d)))
        s2 = jnp.pad(s2, ((0, 0), (0, d_pad - d)))

    # Column tile: full feature dim if it fits the block budget at `sublane` rows,
    # otherwise a large multiple of 128 (guards very wide d from blowing VMEM).
    if d_pad * itemsize * sublane <= block_bytes:
        tc = d_pad
    else:
        tc = max(128, (block_bytes // (sublane * itemsize) // 128) * 128)
    tr = _row_tile(rows, tc * itemsize, sublane, block_bytes)

    out = pl.pallas_call(
        _scaled_add_kernel,
        out_shape=jax.ShapeDtypeStruct((rows, d_pad), dtype),
        grid=(pl.cdiv(rows, tr), pl.cdiv(d_pad, tc)),
        in_specs=[
            pl.BlockSpec((tr, tc), lambda i, j: (i, j)),
            pl.BlockSpec((tr, tc), lambda i, j: (i, j)),
            pl.BlockSpec((1, tc), lambda i, j: (0, j)),
        ],
        out_specs=pl.BlockSpec((tr, tc), lambda i, j: (i, j)),
        compiler_params=pltpu.CompilerParams(
            dimension_semantics=("parallel", "parallel"),
            vmem_limit_bytes=_VMEM_LIMIT_BYTES,
        ),
    )(x2, r2, s2)
    if d_pad != d:
        out = out[:, :d]
    return out.reshape(orig_shape)


def _reference(x, residual, residual_scale=None, scale_residual_constant=1.0):
    """Pure-JAX mirror of the PyTorch forward."""
    r = residual
    if residual_scale is not None:
        r = r * residual_scale
    if scale_residual_constant != 1:
        r = r * scale_residual_constant
    return x + r


if __name__ == "__main__":
    # Small transformer-ish shapes: batch=2, seq=8, dim=128.
    batch, seq, dim = 2, 8, 128

    key = jax.random.PRNGKey(0)
    kx, kr, ks = jax.random.split(key, 3)
    x = jax.random.normal(kx, (batch, seq, dim), jnp.float32)
    residual = jax.random.normal(kr, (batch, seq, dim), jnp.float32)
    residual_scale = 1.0 + 0.1 * jax.random.normal(ks, (dim,), jnp.float32)

    # Case 1: default module config (scale_residual=False, constant=1.0) -> plain add.
    out_plain = jax.block_until_ready(residual_forward(x, residual))
    ref_plain = _reference(x, residual)
    assert out_plain.shape == x.shape and out_plain.dtype == x.dtype
    assert jnp.allclose(out_plain, ref_plain, rtol=1e-6, atol=1e-6), "plain add mismatch"

    # Case 2: scale_residual=True with scale_residual_constant=0.5.
    out_scaled = jax.block_until_ready(
        residual_forward(x, residual, residual_scale, scale_residual_constant=0.5)
    )
    ref_scaled = _reference(x, residual, residual_scale, 0.5)
    assert out_scaled.shape == x.shape and out_scaled.dtype == x.dtype
    assert jnp.allclose(out_scaled, ref_scaled, rtol=1e-5, atol=1e-6), "scaled add mismatch"

    print("KERNEL_OK")
</pallas_src>

<mosaic_0001>
module attributes {stable_mosaic.version = 11 : i64} {
  func.func @kernel(%arg0: i32, %arg1: memref<1x2048xf32, #tpu.memory_space<vmem>>, %arg2: memref<1x2048xf32, #tpu.memory_space<vmem>>, %arg3: memref<1x2048xf32, #tpu.memory_space<vmem>>) attributes {dimension_semantics = [#tpu.dimension_semantics<parallel>], iteration_bounds = array<i64: 1>, scalar_prefetch = 0 : i64, scratch_operands = 0 : i64, tpu.core_type = #tpu.core_type<tc>, window_params = [{transform_indices = @transform_0, window_bounds = array<i64: 1, 2048>}, {transform_indices = @transform_1, window_bounds = array<i64: 1, 2048>}, {transform_indices = @transform_2, window_bounds = array<i64: 1, 2048>}]} {
    %c0 = arith.constant 0 : index
    %c0_0 = arith.constant 0 : index
    %0 = vector.load %arg2[%c0, %c0_0] : memref<1x2048xf32, #tpu.memory_space<vmem>>, vector<1x2048xf32>
    %c0_1 = arith.constant 0 : index
    %c0_2 = arith.constant 0 : index
    %1 = vector.load %arg1[%c0_1, %c0_2] : memref<1x2048xf32, #tpu.memory_space<vmem>>, vector<1x2048xf32>
    %2 = arith.addf %1, %0 : vector<1x2048xf32>
    %c0_3 = arith.constant 0 : index
    %c0_4 = arith.constant 0 : index
    %3 = vector.load %arg3[%c0_3, %c0_4] : memref<1x2048xf32, #tpu.memory_space<vmem>>, vector<1x2048xf32>
    tpu.vector_store %arg3[%c0_3, %c0_4], %2 {strides = array<i32>} : memref<1x2048xf32, #tpu.memory_space<vmem>>, vector<1x2048xf32>,
    return
  }
  func.func @transform_0(%arg0: i32) -> (i32, i32) {
    %c0_i32 = arith.constant 0 : i32
    %c0_i32_0 = arith.constant 0 : i32
    return %arg0, %c0_i32 : i32, i32
  }
  func.func @transform_1(%arg0: i32) -> (i32, i32) {
    %c0_i32 = arith.constant 0 : i32
    %c0_i32_0 = arith.constant 0 : i32
    return %arg0, %c0_i32 : i32, i32
  }
  func.func @transform_2(%arg0: i32) -> (i32, i32) {
    %c0_i32 = arith.constant 0 : i32
    %c0_i32_0 = arith.constant 0 : i32
    return %arg0, %c0_i32 : i32, i32
  }
}

</mosaic_0001>

<bundles_post_ra>
// kernel: residual_forward.1
= control target key start
LH: loop header
LB: loop body
LE: loop exit
PB: predicated region body
PF: predicated region fallthrough
CT: control target
= control target key end

     0   :  { %7 = vsyncpa [#allocation3], 0  ;;  %s174_s0 = inlined_call_operand.hbm [shape: f32[1,2048], index: 0, kind: input, shape index: {}]   ;;  %s175_s1 = inlined_call_operand.hbm [shape: f32[1,2048], index: 1, kind: input, shape index: {}]   ;;  %s176_s2 = inlined_call_operand.hbm [shape: f32[1,2048], index: 2, kind: output, shape index: {}]  }
   0x1   :  { %8 = vsyncpa [#allocation6], 0 }
   0x2   :  { %9 = vsyncpa [#allocation4], 0  ;;  %s15_s11 = sshll.u32 %s174_s0, 4  ;;  %s147_s12 = smov [#allocation2]   ;;  %s16_s11 = int_to_ptr.hbm [resolvable:$true] %s15_s11 }
   0x3   :  { %s17_s13 = sshll.u32 %s147_s12, 4  ;;  %s26_s16 = sshll.u32 %s175_s1, 4  ;;  %s18_s13 = int_to_ptr.vmem [resolvable:$true] %s17_s13  ;;  %s27_s16 = int_to_ptr.hbm [resolvable:$true] %s26_s16 }
   0x4   :  { %20 = dma.hbm_to_vmem [thread:$0]  %s16_s11, 256, %s18_s13, [#allocation3]  }
   0x5   :  { %s148_s17 = smov [#allocation5]  }
   0x6   :  { %s28_s18 = sshll.u32 %s148_s17, 4  ;;  %s29_s18 = int_to_ptr.vmem [resolvable:$true] %s28_s18 }
   0x7   :  { %31 = dma.hbm_to_vmem [thread:$0]  %s27_s16, 256, %s29_s18, [#allocation6]  }
   0x8   :  { %141 = dma.done.wait [#allocation3], 256  }
   0x9   :  { %142 = vsyncadd [#allocation3], 4294967040 }
   0xa   :  { %143 = dma.done.wait [#allocation6], 256  }
   0xb   :  { %144 = vsyncadd [#allocation6], 4294967040  ;;  %s149_s19 = smov [#allocation7]   ;;  %s55_s22 = sshll.u32 %s176_s2, 4  ;;  %v40_v0 = vld [vmem:[#allocation5] sm:$0xff]  ;;  %v42_v1 = vld [vmem:[#allocation2] sm:$0xff]  ;;  %s56_s22 = int_to_ptr.hbm [resolvable:$true] %s55_s22 }
   0xc   :  { %s53_s0 = sshll.u32 %s149_s19, 4  ;;  %v41_v2 = vld [vmem:[#allocation5 + $0x8] sm:$0xff]  ;;  %v44_v3 = vadd.f32 %v42_v1, %v40_v0  ;;  %v43_v4 = vld [vmem:[#allocation2 + $0x8] sm:$0xff]  ;;  %s54_s0 = int_to_ptr.vmem [resolvable:$true] %s53_s0 }
   0xd   :  { %v45_v5 = vadd.f32 %v43_v4, %v41_v2 }
   0xe   :  { %46 = vst [vmem:[#allocation7] sm:$0xff] %v44_v3 }
   0xf   :  { %47 = vst [vmem:[#allocation7 + $0x8] sm:$0xff] %v45_v5 }
  0x10   :  { %58 = dma.vmem_to_hbm [thread:$0]  %s54_s0, 256, %s56_s22, [#allocation4]  }
  0x11   :  { %145 = dma.done.wait [#allocation4], 256  }
  0x12   :  { %146 = vsyncadd [#allocation4], 4294967040 }
  0x13   :  { %63 = vsyncpa [#allocation3], 1 }
  0x14   :  { %64 = vsyncpa [#allocation6], 1 }
  0x15   :  { %65 = vsyncpa [#allocation4], 1 }

</bundles_post_ra>
